<compile_context>
chip_gen: v5e
topology: v5e:2x2
jax: 0.10.0
libtpu: 0.0.40
codegen_flags: <defaults>
</compile_context>

<pallas_src>
import functools

import numpy as np
import jax
import jax.numpy as jnp
from jax import lax
from jax.experimental import pallas as pl
from jax.experimental.pallas import tpu as pltpu


# ----------------------------------------------------------------------------
# Fused kernel.  Grid = (N, D // td); for batch row i and D-tile d:
#   mixed = where(mask, x[rand_index[i]], x[i])                 (paste)
#   logits_acc += mixed_bf16 @ W_bf16                           (MXU, f32 acc)
#   at d == last: per-row mixed cross-entropy from the accumulated logits.
# ----------------------------------------------------------------------------
def _fused_cutmix_ce_kernel(ridx_ref, ta_ref, tb_ref,      # scalar prefetch (SMEM)
                            x_ref, xp_ref, m_ref, w_ref,   # VMEM inputs
                            mixed_ref, loss_ref,           # outputs
                            acc_ref,                       # VMEM scratch (1, Kp) f32
                            *, num_classes, lam):
    i = pl.program_id(0)
    d = pl.program_id(1)
    nd = pl.num_programs(1)

    x = x_ref[0]            # (1, td) f32   row i
    xp = xp_ref[0]          # (1, td) f32   row rand_index[i] (gathered by index_map)
    m = m_ref[...]          # (1, td) f32   {0,1} bbox paste mask (precomputed)
    mixed = jnp.where(m > 0.5, xp, x)
    mixed_ref[0] = mixed    # lane-dense store of the mixed tile

    @pl.when(d == 0)
    def _():
        acc_ref[...] = jnp.zeros_like(acc_ref)

    # Tiled linear "model": accumulate logits over the D reduction axis.
    acc_ref[...] += jnp.dot(mixed.astype(jnp.bfloat16), w_ref[...],
                            preferred_element_type=jnp.float32)

    @pl.when(d == nd - 1)
    def _():
        logits = acc_ref[...]                                      # (1, Kp) f32
        col = lax.broadcasted_iota(jnp.int32, logits.shape, 1)
        neg = jnp.float32(-1e30)
        lmask = jnp.where(col < num_classes, logits, neg)          # mask padded K
        mx = jnp.max(lmask, axis=-1, keepdims=True)
        lse = mx + jnp.log(jnp.sum(jnp.exp(lmask - mx), axis=-1, keepdims=True))
        ta = ta_ref[i]
        tb = tb_ref[i]
        logit_a = jnp.sum(jnp.where(col == ta, lmask, 0.0), axis=-1, keepdims=True)
        logit_b = jnp.sum(jnp.where(col == tb, lmask, 0.0), axis=-1, keepdims=True)
        ce_a = lse - logit_a                                       # (1, 1)
        ce_b = lse - logit_b                                       # (1, 1)
        loss_ref[...] = (lam * ce_a + (1.0 - lam) * ce_b).reshape(1, 1, 1)


def _pick_d_tile(D):
    for cand in (512, 256, 128):
        if D % cand == 0:
            return cand
    return D  # fall back to a single full-row tile


def fused_cutmix_loss(batch_X, w, rand_index, target_a, target_b,
                      mask_flat, lam_adj):
    N, C, H, W = batch_X.shape
    D = C * H * W
    K = w.shape[1]
    Kp = max(128, ((K + 127) // 128) * 128)      # pad classes to MXU lane width

    td = _pick_d_tile(D)
    nd = D // td

    x3 = batch_X.reshape(N, 1, D)                # lane-dense flattened view
    w_pad = jnp.zeros((D, Kp), jnp.bfloat16).at[:, :K].set(w.astype(jnp.bfloat16))

    grid_spec = pltpu.PrefetchScalarGridSpec(
        num_scalar_prefetch=3,                   # rand_index, target_a, target_b
        grid=(N, nd),                            # reduction axis (D tiles) last
        in_specs=[
            pl.BlockSpec((1, 1, td), lambda i, d, ridx, ta, tb: (i, 0, d)),        # x
            pl.BlockSpec((1, 1, td), lambda i, d, ridx, ta, tb: (ridx[i], 0, d)),  # x[perm]
            pl.BlockSpec((1, td),    lambda i, d, ridx, ta, tb: (0, d)),           # mask
            pl.BlockSpec((td, Kp),   lambda i, d, ridx, ta, tb: (d, 0)),           # W
        ],
        out_specs=[
            pl.BlockSpec((1, 1, td), lambda i, d, ridx, ta, tb: (i, 0, d)),        # mixed
            pl.BlockSpec((1, 1, 1),  lambda i, d, ridx, ta, tb: (i, 0, 0)),        # loss/row
        ],
        scratch_shapes=[pltpu.VMEM((1, Kp), jnp.float32)],
    )

    mixed3, loss_rows = pl.pallas_call(
        functools.partial(_fused_cutmix_ce_kernel,
                          num_classes=K, lam=float(lam_adj)),
        out_shape=(jax.ShapeDtypeStruct((N, 1, D), batch_X.dtype),
                   jax.ShapeDtypeStruct((N, 1, 1), jnp.float32)),
        grid_spec=grid_spec,
        compiler_params=pltpu.CompilerParams(
            dimension_semantics=("parallel", "arbitrary")),
    )(rand_index, target_a, target_b, x3, x3, mask_flat, w_pad)

    mixed = mixed3.reshape(N, C, H, W)
    loss = jnp.mean(loss_rows)        # mean over the GLOBAL batch, outside kernel
    return loss, mixed


# ----------------------------------------------------------------------------
# Host-side glue reproducing the module's forward (randomness stays on host,
# matching np.random.beta / torch.randperm / rand_bbox in the original).
# ----------------------------------------------------------------------------
def rand_bbox(size, lam, rng):
    # Canonical CutMix helper: box coords along dim 2 bounded by size[2],
    # along dim 3 by size[3]; cut extents derived from the same dims.
    W = size[2]
    H = size[3]
    cut_rat = np.sqrt(1.0 - lam)
    cut_w = int(W * cut_rat)
    cut_h = int(H * cut_rat)
    cx = int(rng.integers(W))
    cy = int(rng.integers(H))
    bbx1 = int(np.clip(cx - cut_w // 2, 0, W))
    bby1 = int(np.clip(cy - cut_h // 2, 0, H))
    bbx2 = int(np.clip(cx + cut_w // 2, 0, W))
    bby2 = int(np.clip(cy + cut_h // 2, 0, H))
    return bbx1, bby1, bbx2, bby2


def cutmix_loss_forward(batch_X, label1, label2, label3, w, beta=1.0, seed=0):
    del label2, label3                    # unused by the original forward's loss
    N, C, H, W = batch_X.shape
    D = C * H * W

    rng = np.random.default_rng(seed)
    lam = float(rng.beta(beta, beta))
    rand_index_np = rng.permutation(N).astype(np.int32)
    bbx1, bby1, bbx2, bby2 = rand_bbox(batch_X.shape, lam, rng)

    # Adjusted lam (the lam actually used in the loss, per the module).
    lam_adj = 1.0 - (bbx2 - bbx1) * (bby2 - bby1) / float(W * H)

    # TODO(synk): `target` is undefined in the source module; use label1.
    rand_index = jnp.asarray(rand_index_np)
    target_a = label1.astype(jnp.int32)
    target_b = jnp.take(target_a, rand_index)

    # Precompute the (1, D) paste mask once (depends only on bbox); avoids
    # re-issuing iota/compare work on every grid step inside the kernel.
    hh = np.arange(H)[:, None]
    ww = np.arange(W)[None, :]
    m2d = (hh >= bbx1) & (hh < bbx2) & (ww >= bby1) & (ww < bby2)
    mask_flat = jnp.asarray(
        np.broadcast_to(m2d[None], (C, H, W)).reshape(1, D).astype(np.float32))

    loss, mixed = fused_cutmix_loss(batch_X, w, rand_index, target_a, target_b,
                                    mask_flat, lam_adj)
    aux = dict(lam_adj=lam_adj, rand_index=rand_index,
               bbox=(bbx1, bby1, bbx2, bby2),
               target_a=target_a, target_b=target_b)
    return loss, mixed, aux


# Pure-JAX reference (same bf16-operand / f32-accumulate matmul precision).
def reference(batch_X, w, rand_index, bbox, lam_adj, target_a, target_b):
    bbx1, bby1, bbx2, bby2 = bbox
    x_perm = jnp.take(batch_X, rand_index, axis=0)
    mixed = batch_X.at[:, :, bbx1:bbx2, bby1:bby2].set(
        x_perm[:, :, bbx1:bbx2, bby1:bby2])
    N = batch_X.shape[0]
    logits = jnp.dot(mixed.reshape(N, -1).astype(jnp.bfloat16),
                     w.astype(jnp.bfloat16),
                     preferred_element_type=jnp.float32)
    logp = jax.nn.log_softmax(logits, axis=-1)
    ce_a = -jnp.mean(jnp.take_along_axis(logp, target_a[:, None], axis=1))
    ce_b = -jnp.mean(jnp.take_along_axis(logp, target_b[:, None], axis=1))
    return lam_adj * ce_a + (1.0 - lam_adj) * ce_b, mixed


if __name__ == "__main__":
    # Small deterministic inputs: batch=2, channels=4, spatial=16x16, 8 classes.
    N, C, H, W_sp, K = 2, 4, 16, 16, 8
    key = jax.random.PRNGKey(0)
    kx, kw, kl = jax.random.split(key, 3)

    batch_X = jax.random.normal(kx, (N, C, H, W_sp), dtype=jnp.float32)
    label1 = jax.random.randint(kl, (N,), 0, K, dtype=jnp.int32)
    label2 = label1   # unused by the forward's loss (matches original signature)
    label3 = label1   # unused
    # Deterministic substituted "model": linear classifier (C*H*W, K).
    w = jax.random.normal(kw, (C * H * W_sp, K), dtype=jnp.float32) * 0.02

    loss, mixed, aux = cutmix_loss_forward(batch_X, label1, label2, label3, w,
                                           beta=1.0, seed=0)
    loss = jax.block_until_ready(loss)

    ref_loss, ref_mixed = reference(batch_X, w, aux["rand_index"], aux["bbox"],
                                    aux["lam_adj"], aux["target_a"],
                                    aux["target_b"])

    np.testing.assert_allclose(np.asarray(mixed), np.asarray(ref_mixed),
                               rtol=0.0, atol=0.0)
    np.testing.assert_allclose(float(loss), float(ref_loss),
                               rtol=1e-4, atol=1e-4)
    print("KERNEL_OK")
</pallas_src>

<mosaic_0001>
module attributes {stable_mosaic.version = 11 : i64} {
  func.func @_fused_cutmix_ce_kernel(%arg0: i32, %arg1: i32, %arg2: memref<2xi32, #tpu.memory_space<smem>>, %arg3: memref<2xi32, #tpu.memory_space<smem>>, %arg4: memref<2xi32, #tpu.memory_space<smem>>, %arg5: memref<1x1x512xf32, #tpu.memory_space<vmem>>, %arg6: memref<1x1x512xf32, #tpu.memory_space<vmem>>, %arg7: memref<1x512xf32, #tpu.memory_space<vmem>>, %arg8: memref<512x128xbf16, #tpu.memory_space<vmem>>, %arg9: memref<1x1x512xf32, #tpu.memory_space<vmem>>, %arg10: memref<1x1x1xf32, #tpu.memory_space<vmem>>, %arg11: memref<1x128xf32, #tpu.memory_space<vmem>>) attributes {dimension_semantics = [#tpu.dimension_semantics<parallel>, #tpu.dimension_semantics<arbitrary>], iteration_bounds = array<i64: 2, 2>, scalar_prefetch = 3 : i64, scratch_operands = 1 : i64, tpu.core_type = #tpu.core_type<tc>, window_params = [{transform_indices = @transform_0, window_bounds = array<i64: 1, 1, 512>}, {transform_indices = @transform_1, window_bounds = array<i64: 1, 1, 512>}, {transform_indices = @transform_2, window_bounds = array<i64: 1, 512>}, {transform_indices = @transform_3, window_bounds = array<i64: 512, 128>}, {transform_indices = @transform_4, window_bounds = array<i64: 1, 1, 512>}, {transform_indices = @transform_5, window_bounds = array<i64: 1, 1, 1>}]} {
    %c0 = arith.constant 0 : index
    %c0_0 = arith.constant 0 : index
    %c0_1 = arith.constant 0 : index
    %0 = vector.load %arg5[%c0, %c0_0, %c0_1] : memref<1x1x512xf32, #tpu.memory_space<vmem>>, vector<1x1x512xf32>
    %1 = vector.shape_cast %0 : vector<1x1x512xf32> to vector<1x512xf32>
    %c0_2 = arith.constant 0 : index
    %c0_3 = arith.constant 0 : index
    %c0_4 = arith.constant 0 : index
    %2 = vector.load %arg6[%c0_2, %c0_3, %c0_4] : memref<1x1x512xf32, #tpu.memory_space<vmem>>, vector<1x1x512xf32>
    %3 = vector.shape_cast %2 : vector<1x1x512xf32> to vector<1x512xf32>
    %c0_5 = arith.constant 0 : index
    %c0_6 = arith.constant 0 : index
    %4 = vector.load %arg7[%c0_5, %c0_6] : memref<1x512xf32, #tpu.memory_space<vmem>>, vector<1x512xf32>
    %cst = arith.constant 5.000000e-01 : f32
    %5 = vector.broadcast %cst : f32 to vector<1x512xf32>
    %6 = arith.cmpf ogt, %4, %5 : vector<1x512xf32>
    %7 = arith.select %6, %3, %1 : vector<1x512xi1>, vector<1x512xf32>
    %c0_7 = arith.constant 0 : index
    %c0_8 = arith.constant 0 : index
    %c0_9 = arith.constant 0 : index
    %8 = vector.load %arg9[%c0_7, %c0_8, %c0_9] : memref<1x1x512xf32, #tpu.memory_space<vmem>>, vector<1x1x512xf32>
    %9 = vector.shape_cast %8 : vector<1x1x512xf32> to vector<1x512xf32>
    %10 = vector.shape_cast %7 : vector<1x512xf32> to vector<1x1x512xf32>
    tpu.vector_store %arg9[%c0_7, %c0_8, %c0_9], %10 {strides = array<i32>} : memref<1x1x512xf32, #tpu.memory_space<vmem>>, vector<1x1x512xf32>,
    %c0_i32 = arith.constant 0 : i32
    %11 = arith.cmpi eq, %arg1, %c0_i32 : i32
    %12 = arith.extui %11 : i1 to i32
    %c0_i32_10 = arith.constant 0 : i32
    %13 = arith.cmpi ne, %12, %c0_i32_10 : i32
    scf.if %13 {
      %cst_19 = arith.constant 0.000000e+00 : f32
      %23 = vector.broadcast %cst_19 : f32 to vector<1x128xf32>
      %c0_20 = arith.constant 0 : index
      %c0_21 = arith.constant 0 : index
      %24 = vector.load %arg11[%c0_20, %c0_21] : memref<1x128xf32, #tpu.memory_space<vmem>>, vector<1x128xf32>
      tpu.vector_store %arg11[%c0_20, %c0_21], %23 {strides = array<i32>} : memref<1x128xf32, #tpu.memory_space<vmem>>, vector<1x128xf32>,
    } else {
    }
    %c0_11 = arith.constant 0 : index
    %c0_12 = arith.constant 0 : index
    %14 = vector.load %arg11[%c0_11, %c0_12] : memref<1x128xf32, #tpu.memory_space<vmem>>, vector<1x128xf32>
    %15 = arith.truncf %7 : vector<1x512xf32> to vector<1x512xbf16>
    %c0_13 = arith.constant 0 : index
    %c0_14 = arith.constant 0 : index
    %16 = vector.load %arg8[%c0_13, %c0_14] : memref<512x128xbf16, #tpu.memory_space<vmem>>, vector<512x128xbf16>
    %cst_15 = arith.constant dense<0.000000e+00> : vector<1x128xf32>
    %17 = tpu.matmul %15, %16, %cst_15 {dimension_numbers = #tpu.dot_dimension_numbers<[1], [0], [0], [1], [0, 0, 1, 1], [], []>} : vector<1x512xbf16>, vector<512x128xbf16>, vector<1x128xf32> -> vector<1x128xf32>
    %18 = arith.addf %14, %17 : vector<1x128xf32>
    %c0_16 = arith.constant 0 : index
    %c0_17 = arith.constant 0 : index
    %19 = vector.load %arg11[%c0_16, %c0_17] : memref<1x128xf32, #tpu.memory_space<vmem>>, vector<1x128xf32>
    tpu.vector_store %arg11[%c0_16, %c0_17], %18 {strides = array<i32>} : memref<1x128xf32, #tpu.memory_space<vmem>>, vector<1x128xf32>,
    %c1_i32 = arith.constant 1 : i32
    %20 = arith.cmpi eq, %arg1, %c1_i32 : i32
    %21 = arith.extui %20 : i1 to i32
    %c0_i32_18 = arith.constant 0 : i32
    %22 = arith.cmpi ne, %21, %c0_i32_18 : i32
    scf.if %22 {
      %c0_19 = arith.constant 0 : index
      %c0_20 = arith.constant 0 : index
      %23 = vector.load %arg11[%c0_19, %c0_20] : memref<1x128xf32, #tpu.memory_space<vmem>>, vector<1x128xf32>
      %24 = tpu.iota {dimensions = array<i32: 1>} : vector<1x128xi32>
      %c8_i32 = arith.constant 8 : i32
      %25 = vector.broadcast %c8_i32 : i32 to vector<1x128xi32>
      %26 = arith.cmpi slt, %24, %25 : vector<1x128xi32>
      %cst_21 = arith.constant -1.000000e+30 : f32
      %27 = vector.broadcast %cst_21 : f32 to vector<1x128xf32>
      %28 = arith.select %26, %23, %27 : vector<1x128xi1>, vector<1x128xf32>
      %cst_22 = arith.constant dense<0xFF800000> : vector<1xf32>
      %29 = vector.multi_reduction <maximumf>, %28, %cst_22 [1] : vector<1x128xf32> to vector<1xf32>
      %30 = vector.shape_cast %29 : vector<1xf32> to vector<1x1xf32>
      %31 = vector.broadcast %30 : vector<1x1xf32> to vector<1x128xf32>
      %32 = arith.subf %28, %31 : vector<1x128xf32>
      %33 = math.exp %32 : vector<1x128xf32>
      %cst_23 = arith.constant dense<0.000000e+00> : vector<1xf32>
      %34 = vector.multi_reduction <add>, %33, %cst_23 [1] : vector<1x128xf32> to vector<1xf32>
      %35 = vector.shape_cast %34 : vector<1xf32> to vector<1x1xf32>
      %36 = math.log %35 : vector<1x1xf32>
      %37 = arith.addf %30, %36 : vector<1x1xf32>
      %38 = arith.index_cast %arg0 : i32 to index
      %39 = memref.load %arg3[%38] : memref<2xi32, #tpu.memory_space<smem>>
      %40 = arith.index_cast %arg0 : i32 to index
      %41 = memref.load %arg4[%40] : memref<2xi32, #tpu.memory_space<smem>>
      %42 = vector.broadcast %39 : i32 to vector<1x128xi32>
      %43 = arith.cmpi eq, %24, %42 : vector<1x128xi32>
      %cst_24 = arith.constant 0.000000e+00 : f32
      %44 = vector.broadcast %cst_24 : f32 to vector<1x128xf32>
      %45 = arith.select %43, %28, %44 : vector<1x128xi1>, vector<1x128xf32>
      %cst_25 = arith.constant dense<0.000000e+00> : vector<1xf32>
      %46 = vector.multi_reduction <add>, %45, %cst_25 [1] : vector<1x128xf32> to vector<1xf32>
      %47 = vector.shape_cast %46 : vector<1xf32> to vector<1x1xf32>
      %48 = vector.broadcast %41 : i32 to vector<1x128xi32>
      %49 = arith.cmpi eq, %24, %48 : vector<1x128xi32>
      %cst_26 = arith.constant 0.000000e+00 : f32
      %50 = vector.broadcast %cst_26 : f32 to vector<1x128xf32>
      %51 = arith.select %49, %28, %50 : vector<1x128xi1>, vector<1x128xf32>
      %cst_27 = arith.constant dense<0.000000e+00> : vector<1xf32>
      %52 = vector.multi_reduction <add>, %51, %cst_27 [1] : vector<1x128xf32> to vector<1xf32>
      %53 = vector.shape_cast %52 : vector<1xf32> to vector<1x1xf32>
      %54 = arith.subf %37, %47 : vector<1x1xf32>
      %55 = arith.subf %37, %53 : vector<1x1xf32>
      %cst_28 = arith.constant 9.218750e-01 : f32
      %56 = vector.broadcast %cst_28 : f32 to vector<1x1xf32>
      %57 = arith.mulf %56, %54 : vector<1x1xf32>
      %cst_29 = arith.constant 7.812500e-02 : f32
      %58 = vector.broadcast %cst_29 : f32 to vector<1x1xf32>
      %59 = arith.mulf %58, %55 : vector<1x1xf32>
      %60 = arith.addf %57, %59 : vector<1x1xf32>
      %61 = vector.shape_cast %60 : vector<1x1xf32> to vector<1x1x1xf32>
      %c0_30 = arith.constant 0 : index
      %c0_31 = arith.constant 0 : index
      %c0_32 = arith.constant 0 : index
      %62 = vector.load %arg10[%c0_30, %c0_31, %c0_32] : memref<1x1x1xf32, #tpu.memory_space<vmem>>, vector<1x1x1xf32>
      tpu.vector_store %arg10[%c0_30, %c0_31, %c0_32], %61 {strides = array<i32>} : memref<1x1x1xf32, #tpu.memory_space<vmem>>, vector<1x1x1xf32>,
    } else {
    }
    return
  }
  func.func @transform_0(%arg0: i32, %arg1: i32, %arg2: memref<2xi32, #tpu.memory_space<smem>>, %arg3: memref<2xi32, #tpu.memory_space<smem>>, %arg4: memref<2xi32, #tpu.memory_space<smem>>) -> (i32, i32, i32) {
    %c0_i32 = arith.constant 0 : i32
    %c0_i32_0 = arith.constant 0 : i32
    return %arg0, %c0_i32, %arg1 : i32, i32, i32
  }
  func.func @transform_1(%arg0: i32, %arg1: i32, %arg2: memref<2xi32, #tpu.memory_space<smem>>, %arg3: memref<2xi32, #tpu.memory_space<smem>>, %arg4: memref<2xi32, #tpu.memory_space<smem>>) -> (i32, i32, i32) {
    %0 = arith.index_cast %arg0 : i32 to index
    %1 = memref.load %arg2[%0] : memref<2xi32, #tpu.memory_space<smem>>
    %c0_i32 = arith.constant 0 : i32
    %c0_i32_0 = arith.constant 0 : i32
    return %1, %c0_i32, %arg1 : i32, i32, i32
  }
  func.func @transform_2(%arg0: i32, %arg1: i32, %arg2: memref<2xi32, #tpu.memory_space<smem>>, %arg3: memref<2xi32, #tpu.memory_space<smem>>, %arg4: memref<2xi32, #tpu.memory_space<smem>>) -> (i32, i32) {
    %c0_i32 = arith.constant 0 : i32
    %c0_i32_0 = arith.constant 0 : i32
    return %c0_i32, %arg1 : i32, i32
  }
  func.func @transform_3(%arg0: i32, %arg1: i32, %arg2: memref<2xi32, #tpu.memory_space<smem>>, %arg3: memref<2xi32, #tpu.memory_space<smem>>, %arg4: memref<2xi32, #tpu.memory_space<smem>>) -> (i32, i32) {
    %c0_i32 = arith.constant 0 : i32
    %c0_i32_0 = arith.constant 0 : i32
    return %arg1, %c0_i32 : i32, i32
  }
  func.func @transform_4(%arg0: i32, %arg1: i32, %arg2: memref<2xi32, #tpu.memory_space<smem>>, %arg3: memref<2xi32, #tpu.memory_space<smem>>, %arg4: memref<2xi32, #tpu.memory_space<smem>>) -> (i32, i32, i32) {
    %c0_i32 = arith.constant 0 : i32
    %c0_i32_0 = arith.constant 0 : i32
    return %arg0, %c0_i32, %arg1 : i32, i32, i32
  }
  func.func @transform_5(%arg0: i32, %arg1: i32, %arg2: memref<2xi32, #tpu.memory_space<smem>>, %arg3: memref<2xi32, #tpu.memory_space<smem>>, %arg4: memref<2xi32, #tpu.memory_space<smem>>) -> (i32, i32, i32) {
    %c0_i32 = arith.constant 0 : i32
    %c0_i32_0 = arith.constant 0 : i32
    %c0_i32_1 = arith.constant 0 : i32
    return %arg0, %c0_i32, %c0_i32_0 : i32, i32, i32
  }
}

</mosaic_0001>

<bundles_post_ra>
// kernel: tpu_custom_call.1
= control target key start
LH: loop header
LB: loop body
LE: loop exit
PB: predicated region body
PF: predicated region fallthrough
CT: control target
= control target key end

     0   :  { %s1660_s11 = smov [#allocation4]   ;;  %s1661_s12 = smov [#allocation5]   ;;  %s2128_s0 = inlined_call_operand.hbm [shape: s32[2], index: 0, kind: input, shape index: {}]   ;;  %s2129_s3 = inlined_call_operand.hbm [shape: f32[2,1,1024], index: 3, kind: input, shape index: {}]   ;;  %s2130_s4 = inlined_call_operand.hbm [shape: f32[2,1,1024], index: 4, kind: input, shape index: {}]   ;;  %s2131_s5 = inlined_call_operand.hbm [shape: f32[1,1024], index: 5, kind: input, shape index: {}]   ;;  %s2132_s6 = inlined_call_operand.hbm [shape: bf16[1024,128], index: 6, kind: input, shape index: {}]   ;;  %s2133_s7 = inlined_call_operand.hbm [shape: f32[2,1,1024], index: 7, kind: output, shape index: {0}]   ;;  %s2134_s8 = inlined_call_operand.vmem [shape: f32[2,1,1], index: 8, kind: output, shape index: {1}]   ;;  %s2135_s1 = inlined_call_operand.hbm [shape: s32[2], index: 1, kind: input, shape index: {}]   ;;  %s2136_s2 = inlined_call_operand.vmem [shape: s32[2], index: 2, kind: input, shape index: {}]  }
   0x1   :  { %2151 = sst [smem:[#allocation36_spill]] %s2129_s3  ;;  %s15_s29 = sshll.u32 %s2128_s0, 4  ;;  %s16_s29 = int_to_ptr.hbm [resolvable:$true] %s15_s29 }
   0x2   :  { %2152 = sst [smem:[#allocation37_spill]] %s2130_s4  ;;  %s20_s10 = sshll.u32 %s2135_s1, 4  ;;  %s21_s10 = int_to_ptr.hbm [resolvable:$true] %s20_s10 }
   0x3   :  { %2153 = sst [smem:[#allocation38_spill]] %s2131_s5  ;;  %s25_s15 = sshll.u32 %s2136_s2, 4  ;;  %s26_s15 = int_to_ptr.vmem [resolvable:$true] %s25_s15 }
   0x4   :  { %2154 = sst [smem:[#allocation39_spill]] %s2132_s6  ;;  %s1662_s16 = smov [#allocation6]  }
   0x5   :  { %2155 = sst [smem:[#allocation40_spill]] %s2133_s7 }
   0x6   :  { %2156 = sst [smem:[#allocation41_spill]] %s2134_s8 }
   0x7   :  { %18 = dma.hbm_to_smem %s16_s29, 16, %s1660_s11, [#allocation3] }
   0x8   :  { %23 = dma.hbm_to_smem %s21_s10, 16, %s1661_s12, [#allocation3] }
   0x9   :  { %28 = dma.vmem_to_smem %s26_s15, 16, %s1662_s16, [#allocation3] }
   0xa   :  { %1582 = dma.done.wait [#allocation3], 48 }
   0xb   :  { %1583 = vsyncadd [#allocation3], 4294967248 }
   0xc   :  { %31 = sfence }
   0xd   :  { %32 = vsyncpa [#allocation8], 0 }
   0xe   :  { %34 = vsyncpa [#allocation8 + $0x1], 0 }
   0xf   :  { %35 = vsyncpa [#allocation11], 0 }
  0x10   :  { %37 = vsyncpa [#allocation11 + $0x1], 0 }
  0x11   :  { %38 = vsyncpa [#allocation14], 0 }
  0x12   :  { %40 = vsyncpa [#allocation14 + $0x1], 0 }
  0x13   :  { %41 = vsyncpa [#allocation9], 0 }
  0x14   :  { %43 = vsyncpa [#allocation9 + $0x1], 0  ;;  %s1720_s0 = smov 0   ;;  %s1722_s1 = smov 0  }
  0x15   :  { %s1724_s17 = smov 0   ;;  %s1726_s2 = smov 0  }
  0x16   :  { %s1728_s18 = smov 0   ;;  %s1730_s19 = smov 0  }
  0x17   :  { %s1732_s20 = smov 0   ;;  %s1734_s21 = smov 0  }
  0x18   :  { %s1736_s22 = smov 0   ;;  %s1738_s23 = smov 0  }
  0x19   :  { %s1740_s24 = smov 0   ;;  %s1742_s25 = smov 0  }
  0x1a   :  { %s1744_s26 = smov 0   ;;  %s1746_s27 = smov 0  }
  0x1b LB: > { %2157 = sst [smem:[#allocation24_spill]] %s1622_s18  ;;  %s1789_s28 = sadd.s32 4294967295, %s1658_s27   ;;  %s1658_s27 = sphi %s1746_s27, %s49_s27   ;;  %s1654_s26 = sphi %s1744_s26, %s2215_s26   ;;  %s1650_s25 = sphi %s1742_s25, %s2214_s25   ;;  %s1646_s24 = sphi %s1740_s24, %s2205_s24   ;;  %s1642_s23 = sphi %s1738_s23, %s2213_s23   ;;  %s1638_s22 = sphi %s1736_s22, %s2204_s22   ;;  %s1634_s21 = sphi %s1734_s21, %s2212_s21   ;;  %s1630_s20 = sphi %s1732_s20, %s2211_s20   ;;  %s1626_s19 = sphi %s1730_s19, %s2202_s19   ;;  %s1622_s18 = sphi %s1728_s18, %s2201_s18   ;;  %s1618_s2 = sphi %s1726_s2, %s2200_s2   ;;  %s1614_s17 = sphi %s1724_s17, %s2210_s17   ;;  %s1610_s1 = sphi %s1722_s1, %s2209_s1   ;;  %s1606_s0 = sphi %s1720_s0, %s2208_s0  }
  0x1c   : > { %2158 = sst [smem:[#allocation25_spill]] %s1626_s19  ;;  %s58_s29 = sadd.s32 1, %s1650_s25 }
  0x1d   : > { %2159 = sst [smem:[#allocation26_spill]] %s1638_s22  ;;  %p59_p0 = scmp.ge.s32.totalorder %s58_s29, 2 }
  0x1e   : > { %2160 = sst [smem:[#allocation27_spill]] %s1642_s23  ;;  %s61_s30 = sadd.s32 1, %s1654_s26 }
  0x1f   : > { %2161 = sst [smem:[#allocation28_spill]] %s1646_s24  ;;  %p78_p1 = scmp.eq.s32.totalorder %s1658_s27, 0 }
  0x20   : > { %2162 = sst [smem:[#allocation29_spill]] %s1654_s26  ;;  %p2148_p2 = scmp.eq.s32.totalorder %s1789_s28, 0 }
  0x21   : > { %s2217_s29 = smov (%p59_p0, %s58_s29), 0  ;;  %s2219_s30 = smov (!%p59_p0, %s61_s30), %s1654_s26 }
  0x22   : > { %2163 = sst [smem:[#allocation30_spill]] %s2217_s29  ;;  %s1800_s9 = ssub.s32 %s1650_s25, %s2217_s29 }
  0x23   : > { %s93_s10 = sld [smem:[#allocation4 + %s1654_s26]]  ;;  %p63_p3 = scmp.ge.s32.totalorder %s2219_s30, 2 }
  0x24   : > { %s100_s11 = sadd.s32 1, %s1626_s19  ;;  %p107_p4 = scmp.ne.s32.totalorder %s1626_s19, %s1622_s18 }
  0x25   : > { %p113_p5 = scmp.ne.s32.totalorder %s1622_s18, %s1618_s2  ;;  %s2221_s30 = smov (%p63_p3, %s2219_s30), 0 }
  0x26   : > { %2164 = sst [smem:[#allocation31_spill]] %s2221_s30  ;;  %p1811_p6 = por %p107_p4, %p78_p1 }
  0x27   : > { %p1817_p7 = por %p113_p5, %p2148_p2  ;;  %s65_s14 = ssub.s32 %s1654_s26, %s2221_s30 }
  0x28   : > { %s94_s15 = sld [smem:[#allocation4 + %s2221_s30]]  ;;  %s1825_s16 = sor.u32 %s1800_s9, %s65_s14 }
  0x29   : > { %s2166_s13 = scalar_select %p1817_p7, 1, 0 }
  0x2a   : > { %p2147_p9 = scmp.lt.s32.totalorder %s1658_s27, 4  ;;  %s1830_s2 = sshll.u32 %s1650_s25, 2 }
  0x2b   : > { %2167 = sst [smem:[#allocation32_spill]] %s2166_s13  ;;  %s264_s29 = sand.u32 1, %s1658_s27  }
  0x2c   : > { %s266_s7 = sand.u32 1, %s1626_s19   ;;  %p1838_p10 = pnand %p2147_p9, %p1811_p6 }
  0x2d   : > { %s1005_s23 = sshll.u32 %s266_s7, 2  ;;  %p1013_p12 = scmp.ge.s32.totalorder %s1658_s27, 1 }
  0x2e   : > { %s95_s14 = ssub.s32 %s93_s10, %s94_s15  ;;  %s268_s24 = scalar_lea.vmem [#allocation10], %s1005_s23 }
  0x2f   : > { %s97_s8 = sor.u32 %s95_s14, %s1800_s9  ;;  %s1843_s13 = sshll.u32 %s268_s24, 4 }
  0x30   : > { %2169 = sst [smem:[#allocation33_spill]] %s1843_s13  ;;  %p98_p11 = scmp.eq.s32.totalorder %s97_s8, 0 }
  0x31   : > { %s1188_s7 = scalar_select %p1811_p6, [#allocation4], [#allocation16] }
  0x32   : > { %s1849_s18 = scalar_select %p98_p11, %s1626_s19, %s100_s11  }
  0x33   : > { %s1189_s6 = scalar_select %p1811_p6, %s1654_s26, 0 }
  0x34   : > { %2170 = sst [smem:[#allocation34_spill]] %s1849_s18  ;;  %s2223_s7 = smov (!%p2147_p9, %s1188_s7), [#allocation17] }
  0x35   : > { %s2225_s6 = smov (!%p2147_p9, %s1189_s6), 0  ;;  %p325_p13 = scmp.lt.s32.totalorder %s1658_s27, 5 }
  0x36   : > { %s269_s23 = sld [smem:[%s2223_s7 + %s2225_s6]]  ;;  %s999_s11 = sadd.s32 4294967294, %s1658_s27  }
  0x37   : > { %p1860_p0 = pnand %p1013_p12, %p325_p13  ;;  %s2172_s4 = sld [smem:[#allocation37_spill]] }
  0x38   : > { %p68_p3 = scmp.eq.s32.totalorder %s1825_s16, 0  ;;  %s70_s18 = sadd.s32 1, %s1638_s22 }
  0x39   : > { %p77_p4 = scmp.ne.s32.totalorder %s1638_s22, %s1634_s21  ;;  %s1873_s19 = scalar_lea.sflag [#allocation11], %s264_s29 }
  0x3a   : > { %p1382_p6 = pneg %p1838_p10 }
  0x3c   : > { %s1007_s24 = sshll.u32 %s269_s23, 3 }
  0x3d   : > { %s274_s10 = sadd.s32 %s1007_s24, %s1830_s2  ;;  %s1385_s15 = scalar_lea.hbm %s2172_s4, 16 }
  0x3e   : > { %s275_s14 = scalar_lea.hbm %s2172_s4, %s274_s10 }
  0x3f   : > { %s277_s13 = sshll.u32 %s275_s14, 4  ;;  %s278_s13 = int_to_ptr.hbm [resolvable:$true] %s277_s13 }
  0x40   : > { %s1378_s6 = sshra.s32 %s278_s13, 4  ;;  %s1379_s6 = int_to_ptr.hbm [resolvable:$true] %s1378_s6 }
  0x41   : > { %s1380_s7 = scalar_lea.hbm %s1379_s6, 4  ;;  %p1386_p13 = scmp.lt.s32.totalorder %s1379_s6, %s2172_s4 }
  0x42   : > { %p1381_p5 = scmp.ne.s32.totalorder %s1379_s6, %s1380_s7  ;;  %p1387_p8 = scmp.lt.s32.totalorder %s1385_s15, %s1380_s7 }
  0x44   : > { %p1383_p11 = pnand %p1382_p6, %p1381_p5  ;;  %p1388_p9 = por %p1387_p8, %p1386_p13 }
  0x46   : > { %p1384_p12 = pneg %p1383_p11 }
  0x48   : > { %p1389_p2 = pnand %p1388_p9, %p1384_p12 }
  0x4a   : > { %1392 = shalt.err (!%p1389_p2)
}
  0x4b   : > { %s2173_s29 = sld [smem:[#allocation33_spill]]  ;;  %p1898_p2 = por %p78_p1, %p77_p4 }
  0x4c   : > { %s1891_s30 = scalar_select %p68_p3, %s1638_s22, %s70_s18  }
  0x4d   : > { %p83_p8 = scmp.ne.s32.totalorder %s1634_s21, %s1630_s20  ;;  %p191_p9 = scmp.eq.s32.totalorder %s1789_s28, 3 }
  0x4e   : > { %2175 = sst [smem:[#allocation35_spill]] %s1891_s30  ;;  %p197_p5 = scmp.eq.s32.totalorder %s999_s11, 3 }
  0x4f   : > { %p2177_p6 = scmp.eq.s32.totalorder %s1789_s28, 0  ;;  %s1004_s23 = sshll.u32 %s1654_s26, 3 }
  0x50   : > { %p1919_p3 = por %p197_p5, %p83_p8  ;;  %s252_s24 = sadd.s32 %s1004_s23, %s1830_s2 }
  0x51   : > { %s2174_s14 = int_to_ptr.vmem [resolvable:$true] %s2173_s29  ;;  %p1907_p11 = por %p2177_p6, %p83_p8 }
  0x52   : > { %1207 = dma.hbm_to_vmem [thread:$0]  (!%p1838_p10), %s278_s13, 64, %s2174_s14, %s1873_s19  }
  0x53   : > { %s243_s13 = sand.u32 1, %s1638_s22   ;;  %p1915_p10 = por %p191_p9, %p77_p4 }
  0x54   : > { %s1002_s11 = sshll.u32 %s243_s13, 2  ;;  %s2181_s3 = sld [smem:[#allocation36_spill]] }
  0x55   : > { %s247_s15 = scalar_lea.vmem [#allocation7], %s1002_s11  ;;  %p2182_p4 = scmp.lt.s32.totalorder %s1658_s27, 4 }
  0x56   : > { %s257_s10 = sshll.u32 %s247_s15, 4  ;;  %s244_s30 = scalar_lea.sflag [#allocation8], %s243_s13  ;;  %s258_s10 = int_to_ptr.vmem [resolvable:$true] %s257_s10 }
  0x57   : > { %p1200_p12 = pnand %p2182_p4, %p1898_p2  ;;  %s126_s26 = sadd.s32 1, %s1614_s17 }
  0x58   : > { %p133_p13 = scmp.ne.s32.totalorder %s1614_s17, %s1610_s1  ;;  %p2183_p8 = scmp.eq.s32.totalorder %s1800_s9, 0 }
  0x59   : > { %p139_p5 = scmp.ne.s32.totalorder %s1610_s1, %s1606_s0  ;;  %s288_s23 = sand.u32 1, %s1614_s17  }
  0x5a   : > { %s253_s14 = scalar_lea.hbm %s2181_s3, %s252_s24  ;;  %p135_p9 = por %p133_p13, %p78_p1 }
  0x5b   : > { %s255_s4 = sshll.u32 %s253_s14, 4  ;;  %s2184_s5 = sld [smem:[#allocation38_spill]]  ;;  %s256_s4 = int_to_ptr.hbm [resolvable:$true] %s255_s4 }
  0x5c   : > { %1202 = dma.hbm_to_vmem [thread:$0]  (!%p1200_p12), %s256_s4, 64, %s258_s10, %s244_s30  }
  0x5d   : > { %s1938_s11 = scalar_select %p2183_p8, %s1614_s17, %s126_s26  }
  0x5e   : > { %p2185_p2 = pmov %p2177_p6  ;;  %s1008_s4 = sshll.u32 %s288_s23, 2 }
  0x5f   : > { %s290_s9 = scalar_lea.vmem [#allocation12], %s1008_s4  ;;  %p1208_p12 = pnand %p2182_p4, %p135_p9 }
  0x60   : > { %p1951_p6 = por %p139_p5, %p2185_p2  ;;  %s298_s10 = sshll.u32 %s290_s9, 4  ;;  %s299_s10 = int_to_ptr.vmem [resolvable:$true] %s298_s10 }
  0x61   : > { %s294_s6 = scalar_lea.hbm %s2184_s5, %s1830_s2  ;;  %s1010_s26 = sshll.u32 %s288_s23, 8 }
  0x62   : > { %s296_s30 = sshll.u32 %s294_s6, 4  ;;  %s1154_s0 = sshll.u32 %s1650_s25, 8  ;;  %s297_s30 = int_to_ptr.hbm [resolvable:$true] %s296_s30 }
  0x63   : > { %1210 = dma.hbm_to_vmem [thread:$0]  (!%p1208_p12), %s297_s30, 64, %s299_s10, %s1873_s19  }
  0x64   : > { %s309_s12 = scalar_lea.vmem [#allocation13], %s1010_s26  ;;  %s2187_s24 = sld [smem:[#allocation39_spill]] }
  0x65   : > { %s317_s29 = sshll.u32 %s309_s12, 4  ;;  %s306_s5 = scalar_lea.sflag [#allocation14], %s288_s23  ;;  %s318_s29 = int_to_ptr.vmem [resolvable:$true] %s317_s29 }
  0x66   : > { %s1663_s6 = smov 64   ;;  %s1664_s22 = smov 4  }
  0x67   : > { %s1965_s19 = sand.u32 (!%p1860_p0), 1, %s1634_s21  }
  0x68   : > { %329 = sbr.rel (%p1860_p0) target bundleno = 611 (0x263), region = 36  ;;  %s1014_s4 = sshll.u32 (!%p1860_p0), %s1965_s19, 2 }
  0x69   : > { %s332_s30 = scalar_lea.sflag (!%p1860_p0), [#allocation8], %s1965_s19  ;;  %s335_s9 = scalar_lea.vmem (!%p1860_p0), [#allocation7], %s1014_s4 }
  0x6a   : > { %s314_s15 = scalar_lea.hbm %s2187_s24, %s1154_s0 }
  0x6b   : > { %s315_s3 = sshll.u32 %s314_s15, 4  ;;  %s316_s3 = int_to_ptr.hbm [resolvable:$true] %s315_s3 }
  0x6c   : > { %1213 = dma.hbm_to_vmem [thread:$0]  (!%p1208_p12), %s316_s3, 4096, %s318_s29, %s306_s5, %s1663_s6, %s1663_s6, %s1664_s22  }
  0x6d   : > { %1585 = dma.done.wait (%p1907_p11), %s332_s30, 64  }
  0x6e   : > { %1587 = vsyncadd (%p1907_p11), %s332_s30, 4294967232  ;;  %s2188_s3 = sld [smem:[#allocation24_spill]]  ;;  %s341_s22 = sand.u32 1, %s1789_s28  }
  0x6f   : > { %s342_s10 = scalar_lea.sflag [#allocation11], %s341_s22 }
  0x74   : > { %s343_s8 = sand.u32 1, %s2188_s3  }
  0x75   : > { %s1015_s23 = sshll.u32 %s343_s8, 2 }
  0x76   : > { %s345_s26 = scalar_lea.vmem [#allocation10], %s1015_s23 }
  0x77   : > { %1589 = dma.done.wait (%p1817_p7), %s342_s10, 64  }
  0x78   : > { %1591 = vsyncadd (%p1817_p7), %s342_s10, 4294967232  ;;  %s353_s0 = sand.u32 1, %s1610_s1  }
  0x79   : > { %s1016_s12 = sshll.u32 %s353_s0, 2 }
  0x7a   : > { %s355_s29 = scalar_lea.vmem [#allocation12], %s1016_s12 }
  0x7b   : > { %1593 = dma.done.wait (%p1951_p6), %s342_s10, 64  }
  0x7c   : > { %1595 = vsyncadd (%p1951_p6), %s342_s10, 4294967232  ;;  %s1017_s28 = sshll.u32 %s353_s0, 8  ;;  %s362_s7 = scalar_lea.sflag [#allocation14], %s353_s0 }
  0x7d   : > { %s1986_s14 = scalar_lea.vmem [#allocation13], %s1017_s28 }
  0x7e   : > { %1597 = dma.done.wait (%p1951_p6), %s362_s7, 4096  }
  0x7f   : > { %1599 = vsyncadd (%p1951_p6), %s362_s7, 4294963200  ;;  %s2190_s2 = sld [smem:[#allocation28_spill]]  ;;  %v425_v0 = vlaneseq  ;;  %v420_v1 = vld [vmem:[%s335_s9] sm:$0xf]  ;;  %v421_v2 = vld [vmem:[%s345_s26] sm:$0xf] }
  0x80   : > { %s2191_s6 = sld [smem:[#allocation41_spill]]  ;;  %v422_v3 = vld [vmem:[%s355_s29] sm:$0xf]  ;;  %s2005_s13 = scalar_lea.vmem [#allocation15], %s1014_s4 }
  0x81   : > { %vm427_vm0 = vcmp.lt.s32.totalorder %v425_v0, 512  ;;  %vm423_vm1 = vcmp.gt.f32.partialorder %v422_v3, 0.5  ;;  %s2192_s3 = sld [smem:[#allocation27_spill]] }
  0x82   : > { %v2001_v4 = vsel %vm423_vm1, %v421_v2, %v420_v1 }
  0x83   : > { %429 = vst.msk [vmem:[%s2005_s13] sm:$0xf] %vm427_vm0, %v2001_v4 }
  0x85   : > { %p417_p1 = scmp.lt.s32.totalorder %s2190_s2, 1 }
  0x87   : > { %s2227_s2 = smov (!%p417_p1, %s2190_s2), 1  ;;  %p1019_p7 = scmp.ne.s32.totalorder %s2192_s3, 0 }
  0x88   : > { %s419_s30 = scalar_lea.vmem %s2191_s6, %s2227_s2 }
  0x89   : > { %433 = sbr.rel (%p1019_p7) target bundleno = 144 (0x90), region = 56 }
  0x8e   : > { %v1665_v5 = vmov 0.0  }
  0x8f   : > { %434 = vst [vmem:[#allocation2] sm:$0x1] %v1665_v5 }
  0x90 PF: > { %v1162_v6 = vld [vmem:[%s1986_s14 + $0x38] sm:$0xff]  ;;  %v1161_v10 = vld [vmem:[%s1986_s14 + $0x30] sm:$0xff]  ;;  %v1160_v14 = vld [vmem:[%s1986_s14 + $0x28] sm:$0xff]  ;;  %v437_v34 = vperm.slane %v2001_v4, 0  ;;  %v438_v35 = vperm.slane %v2001_v4, 1  ;;  %v439_v38 = vperm.slane %v2001_v4, 2 }
  0x91   : > { %v1170_v7 = vld [vmem:[%s1986_s14 + $0x78] sm:$0xff]  ;;  %705 = vmatpush.bf16.msra.mxu0 %v1162_v6  ;;  %v1169_v11 = vld [vmem:[%s1986_s14 + $0x70] sm:$0xff]  ;;  %v1168_v15 = vld [vmem:[%s1986_s14 + $0x68] sm:$0xff]  ;;  %v440_v39 = vperm.slane %v2001_v4, 3  ;;  %s2193_s4 = sld [smem:[#allocation27_spill]] }
  0x92   : > { %v1178_v8 = vld [vmem:[%s1986_s14 + $0xb8] sm:$0xff]  ;;  %718 = vmatpush.bf16.msra.mxu1 %v1170_v7  ;;  %v1177_v12 = vld [vmem:[%s1986_s14 + $0xb0] sm:$0xff]  ;;  %v1176_v16 = vld [vmem:[%s1986_s14 + $0xa8] sm:$0xff]  ;;  %v445_v42 = vpack.c.bf16 %v437_v34, %v437_v34  ;;  %v446_v43 = vpack.c.bf16 %v438_v35, %v438_v35  ;;  %v447_v44 = vpack.c.bf16 %v439_v38, %v439_v38 }
  0x93   : > { %v1186_v9 = vld [vmem:[%s1986_s14 + $0xf8] sm:$0xff]  ;;  %731 = vmatpush.bf16.msra.mxu2 %v1178_v8  ;;  %v1185_v13 = vld [vmem:[%s1986_s14 + $0xf0] sm:$0xff]  ;;  %v1184_v17 = vld [vmem:[%s1986_s14 + $0xe8] sm:$0xff]  ;;  %v448_v45 = vpack.c.bf16 %v440_v39, %v440_v39 }
  0x94   : > { %744 = vmatpush.bf16.msra.mxu3 %v1186_v9  ;;  %v1159_v18 = vld [vmem:[%s1986_s14 + $0x20] sm:$0xff]  ;;  %v1158_v22 = vld [vmem:[%s1986_s14 + $0x18] sm:$0xff]  ;;  %v1157_v26 = vld [vmem:[%s1986_s14 + $0x10] sm:$0xff] }
  0x95   : > { %706 = vmatpush.bf16.msra.mxu0 %v1161_v10  ;;  %v1167_v19 = vld [vmem:[%s1986_s14 + $0x60] sm:$0xff]  ;;  %v1166_v23 = vld [vmem:[%s1986_s14 + $0x58] sm:$0xff]  ;;  %v1165_v27 = vld [vmem:[%s1986_s14 + $0x50] sm:$0xff] }
  0x96   : > { %719 = vmatpush.bf16.msra.mxu1 %v1169_v11  ;;  %v1175_v20 = vld [vmem:[%s1986_s14 + $0xa0] sm:$0xff]  ;;  %v1174_v24 = vld [vmem:[%s1986_s14 + $0x98] sm:$0xff]  ;;  %v1173_v28 = vld [vmem:[%s1986_s14 + $0x90] sm:$0xff] }
  0x97   : > { %732 = vmatpush.bf16.msra.mxu2 %v1177_v12  ;;  %v1183_v21 = vld [vmem:[%s1986_s14 + $0xe0] sm:$0xff]  ;;  %v1182_v25 = vld [vmem:[%s1986_s14 + $0xd8] sm:$0xff]  ;;  %v1181_v29 = vld [vmem:[%s1986_s14 + $0xd0] sm:$0xff]  ;;  %p1148_p0 = scmp.ne.s32.totalorder %s2193_s4, 1 }
  0x98   : > { %745 = vmatpush.bf16.msra.mxu3 %v1185_v13  ;;  %v1156_v30 = vld [vmem:[%s1986_s14 + $0x8] sm:$0xff]  ;;  %v1155_v36 = vld [vmem:[%s1986_s14] sm:$0xff]  ;;  %s2194_s9 = sld [smem:[#allocation28_spill]] (!%p1148_p0) }
  0x99   : > { %707 = vmatpush.bf16.msra.mxu0 %v1160_v14  ;;  %v1164_v31 = vld [vmem:[%s1986_s14 + $0x48] sm:$0xff]  ;;  %v1163_v37 = vld [vmem:[%s1986_s14 + $0x40] sm:$0xff] }
  0x9a   : > { %720 = vmatpush.bf16.msra.mxu1 %v1168_v15  ;;  %v1172_v32 = vld [vmem:[%s1986_s14 + $0x88] sm:$0xff]  ;;  %v1171_v40 = vld [vmem:[%s1986_s14 + $0x80] sm:$0xff] }
  0x9b   : > { %733 = vmatpush.bf16.msra.mxu2 %v1176_v16  ;;  %v1180_v33 = vld [vmem:[%s1986_s14 + $0xc8] sm:$0xff]  ;;  %v1179_v41 = vld [vmem:[%s1986_s14 + $0xc0] sm:$0xff] }
  0x9c   : > { %746 = vmatpush.bf16.msra.mxu3 %v1184_v17  ;;  %v435_v54 = vld [vmem:[#allocation2] sm:$0x1] }
  0x9d   : > { %708 = vmatpush.bf16.msra.mxu0 %v1159_v18 }
  0x9e   : > { %721 = vmatpush.bf16.msra.mxu1 %v1167_v19  ;;  %s781_s5 = sld [smem:[#allocation5 + %s2194_s9]] (!%p1148_p0) }
  0x9f   : > { %734 = vmatpush.bf16.msra.mxu2 %v1175_v20  ;;  %s782_s22 = sld [smem:[#allocation6 + %s2194_s9]] (!%p1148_p0) }
  0xa0   : > { %747 = vmatpush.bf16.msra.mxu3 %v1183_v21 }
  0xa1   : > { %709 = vmatpush.bf16.msra.mxu0 %v1158_v22 }
  0xa2   : > { %722 = vmatpush.bf16.msra.mxu1 %v1166_v23 }
  0xa3   : > { %735 = vmatpush.bf16.msra.mxu2 %v1174_v24 }
  0xa4   : > { %748 = vmatpush.bf16.msra.mxu3 %v1182_v25 }
  0xa5   : > { %710 = vmatpush.bf16.msra.mxu0 %v1157_v26 }
  0xa6   : > { %723 = vmatpush.bf16.msra.mxu1 %v1165_v27 }
  0xa7   : > { %736 = vmatpush.bf16.msra.mxu2 %v1173_v28 }
  0xa8   : > { %749 = vmatpush.bf16.msra.mxu3 %v1181_v29 }
  0xa9   : > { %711 = vmatpush.bf16.msra.mxu0 %v1156_v30 }
  0xaa   : > { %724 = vmatpush.bf16.msra.mxu1 %v1164_v31 }
  0xab   : > { %737 = vmatpush.bf16.msra.mxu2 %v1172_v32 }
  0xac   : > { %750 = vmatpush.bf16.msra.mxu3 %v1180_v33 }
  0xad   : > { %712 = vmatpush.bf16.msra.mxu0 %v1155_v36 }
  0xae   : > { %725 = vmatpush.bf16.msra.mxu1 %v1163_v37 }
  0xaf   : > { %738 = vmatpush.bf16.msra.mxu2 %v1171_v40 }
  0xb0   : > { %751 = vmatpush.bf16.msra.mxu3 %v1179_v41  ;;  %713 = vmatmul.bf16.vlgmr.msra.gmra.mxu0 %v445_v42 }
  0xb1   : > { %726 = vmatmul.bf16.vlgmr.msra.gmra.mxu1 %v446_v43 }
  0xb2   : > { %739 = vmatmul.bf16.vlgmr.msra.gmra.mxu2 %v447_v44 }
  0xb3   : > { %752 = vmatmul.bf16.vlgmr.msra.gmra.mxu3 %v448_v45 }
 0x12d   : > { %v714_v46 = vpop.f32.mrf.mxu0 }
 0x12e   : > { %v727_v47 = vpop.f32.mrf.mxu1 }
 0x12f   : > { %v728_v48 = vadd.f32 %v727_v47, %v714_v46 }
 0x135   : > { %v740_v49 = vpop.f32.mrf.mxu2  ;;  %v716_v52 = vpop.f32.mrf.mxu0 }
 0x136   : > { %v753_v50 = vpop.f32.mrf.mxu3  ;;  %v741_v51 = vadd.f32 %v740_v49, %v728_v48  ;;  %v729_v53 = vpop.f32.mrf.mxu1 }
 0x138   : > { %v754_v55 = vadd.f32 %v753_v50, %v741_v51 }
 0x13a   : > { %v757_v56 = vadd.f32 %v754_v55, %v435_v54  ;;  %762 = sbr.rel (%p1148_p0) target bundleno = 588 (0x24c), region = 60 }
 0x13c   : > { %758 = vst [vmem:[#allocation2] sm:$0x1] %v757_v56 }
 0x13d   : > { %v742_v57 = vpop.f32.mrf.mxu2 }
 0x13e   : > { %v755_v58 = vpop.f32.mrf.mxu3 }
 0x13f   : > { %v765_v60 = vand.u32 127, %v425_v0  ;;  %vm768_vm2 = vcmask 1040384   ;;  %v783_v63 = vstv %s781_s5  ;;  %v789_v1 = vstv %s782_s22 }
 0x140   : > { %vm800_vm6 = vcmask 0  }
 0x141   : > { %vm766_vm3 = vcmp.lt.s32.totalorder %v765_v60, 8  ;;  %vm784_vm4 = vcmp.eq.s32.totalorder %v765_v60, %v783_v63  ;;  %vm790_vm5 = vcmp.eq.s32.totalorder %v765_v60, %v789_v1 }
 0x143   : > { %v763_v59 = vld [vmem:[#allocation2] sm:$0x1] }
 0x144   : > { %v767_v61 = vsel %vm766_vm3, %v763_v59, -1e+30 }
 0x145   : > { %v769_v62 = vsel %vm768_vm2, %v767_v61, -inf  ;;  %v785_v2 = vsel %vm784_vm4, %v767_v61, 0.0  ;;  %v791_v4 = vsel %vm790_vm5, %v767_v61, 0.0 }
 0x146   : > { %770 = vmax.xlane.f32.xlu0 %v769_v62  ;;  %v786_v3 = vsel %vm768_vm2, %v785_v2, 0.0  ;;  %v792_v5 = vsel %vm768_vm2, %v791_v4, 0.0 }
 0x147   : > { %787 = vadd.xlane.f32.xlu1 %v786_v3 }
 0x14f   : > { %793 = vadd.xlane.f32.xlu1 %v792_v5 }
 0x1b9   : > { %v771_v0 = vpop.xlane.xlu0 %770 }
 0x1ba   : > { %v772_v6 = vsub.f32 %v767_v61, %v771_v0  ;;  %v788_v10 = vpop.xlane.xlu1 %787 }
 0x1bc   : > { %v773_v7 = vmul.f32 1.442695, %v772_v6 }
 0x1be   : > { %1338 = vpow2.f32 %v773_v7 }
 0x1c2   : > { %v794_v14 = vpop.xlane.xlu1 %793 }
 0x1c4   : > { %v1339_v8 = vpop.eup %1338 }
 0x1c5   : > { %v775_v9 = vsel %vm768_vm2, %v1339_v8, 0.0 }
 0x1c6   : > { %776 = vadd.xlane.f32.xlu0 %v775_v9 }
 0x239   : > { %v777_v11 = vpop.xlane.xlu0 %776 }
 0x23a   : > { %1340 = vlog2.f32 %v777_v11 }
 0x240   : > { %v1341_v12 = vpop.eup %1340 }
 0x241   : > { %v779_v13 = vmul.f32 0.6931472, %v1341_v12 }
 0x243   : > { %v780_v15 = vadd.f32 %v779_v13, %v771_v0 }
 0x245   : > { %v795_v16 = vsub.f32 %v780_v15, %v788_v10  ;;  %v796_v17 = vsub.f32 %v780_v15, %v794_v14 }
 0x247   : > { %v797_v18 = vmul.f32 0.921875, %v795_v16  ;;  %v798_v19 = vmul.f32 0.078125, %v796_v17 }
 0x249   : > { %v799_v20 = vadd.f32 %v798_v19, %v797_v18 }
 0x24b   : > { %801 = vst.msk [vmem:[%s419_s30] sm:$0x1] %vm800_vm6, %v799_v20 }
 0x24c PF: > { %s2196_s26 = sld [smem:[#allocation27_spill]]  ;;  %s820_s28 = sshll.u32 %s2005_s13, 4  ;;  %s821_s28 = int_to_ptr.vmem [resolvable:$true] %s820_s28 }
 0x24d   : > { %s2197_s0 = sld [smem:[#allocation28_spill]]  ;;  %s803_s4 = scalar_lea.sflag [#allocation9], %s1965_s19 }
 0x24e   : > { %s2198_s15 = sld [smem:[#allocation40_spill]] }
 0x252   : > { %s1150_s12 = sshll.u32 %s2196_s26, 2 }
 0x253   : > { %s1151_s29 = sshll.u32 %s2197_s0, 3 }
 0x254   : > { %s817_s7 = sadd.s32 %s1151_s29, %s1150_s12  ;;  %s1518_s13 = scalar_lea.hbm %s2198_s15, 16 }
 0x255   : > { %s818_s6 = scalar_lea.hbm %s2198_s15, %s817_s7 }
 0x256   : > { %s822_s3 = sshll.u32 %s818_s6, 4  ;;  %s823_s3 = int_to_ptr.hbm [resolvable:$true] %s822_s3 }
 0x257   : > { %s1512_s2 = sshra.s32 %s823_s3, 4  ;;  %s1513_s2 = int_to_ptr.hbm [resolvable:$true] %s1512_s2 }
 0x258   : > { %s1514_s30 = scalar_lea.hbm %s1513_s2, 4  ;;  %p1519_p9 = scmp.lt.s32.totalorder %s1513_s2, %s2198_s15 }
 0x259   : > { %p1515_p11 = scmp.ne.s32.totalorder %s1513_s2, %s1514_s30  ;;  %p1520_p5 = scmp.lt.s32.totalorder %s1518_s13, %s1514_s30 }
 0x25b   : > { %p1516_p13 = pnand %p1515_p11, %p1915_p10  ;;  %p1521_p2 = por %p1520_p5, %p1519_p9 }
 0x25d   : > { %p1517_p8 = pneg %p1516_p13 }
 0x25f   : > { %p1522_p6 = pnand %p1521_p2, %p1517_p8 }
 0x261   : > { %1525 = shalt.err (!%p1522_p6)
}
 0x262   : > { %1197 = dma.vmem_to_hbm [thread:$0]  (%p1915_p10), %s821_s28, 64, %s823_s3, %s803_s4  }
 0x263 PF: > { %p1219_p4 = scmp.ge.s32.totalorder %s1658_s27, 2  ;;  %s837_s19 = sand.u32 1, %s1630_s20  }
 0x264   : > { %s838_s23 = scalar_lea.sflag [#allocation9], %s837_s19 }
 0x265   : > { %p1215_p12 = pnand %p1219_p4, %p1919_p3 }
 0x267   : > { %p1216_p1 = pneg %p1215_p12 }
 0x269   : > { %1601 = dma.done.wait (%p1216_p1), %s838_s23, 64  }
 0x26a   : > { %1603 = vsyncadd (%p1216_p1), %s838_s23, 4294967232  ;;  %s49_s27 = sadd.s32 1, %s1658_s27   ;;  %s2200_s2 = sld [smem:[#allocation24_spill]] }
 0x26b   : > { %p2081_p7 = scmp.ge.s32.totalorder %s49_s27, 6   ;;  %s2201_s18 = sld [smem:[#allocation25_spill]] }
 0x26c   : > { %s2202_s19 = sld [smem:[#allocation34_spill]]  ;;  %s2208_s0 = smov %s1610_s1 }
 0x26d   : > { %s2203_s26 = sld [smem:[#allocation26_spill]]  ;;  %s2209_s1 = smov %s1614_s17 }
 0x26e   : > { %s2204_s22 = sld [smem:[#allocation35_spill]]  ;;  %s2210_s17 = smov %s1938_s11 }
 0x26f   : > { %s2205_s24 = sld [smem:[#allocation29_spill]]  ;;  %s2211_s20 = smov %s1634_s21 }
 0x270   : > { %s2206_s16 = sld [smem:[#allocation30_spill]]  ;;  %s2213_s23 = smov %s1650_s25 }
 0x271   : > { %s2207_s12 = sld [smem:[#allocation31_spill]] }
 0x273   : > { %s2212_s21 = smov %s2203_s26  ;;  %48 = sbr.rel (!%p2081_p7) target bundleno = 27 (0x1b), region = 138 }
 0x276   : > { %s2214_s25 = smov %s2206_s16 }
 0x277   : > { %s2215_s26 = smov %s2207_s12 }
 0x278   :  { %850 = vsyncpa [#allocation8], 1 }
 0x279   :  { %852 = vsyncpa [#allocation8 + $0x1], 1 }
 0x27a   :  { %853 = vsyncpa [#allocation11], 1 }
 0x27b   :  { %855 = vsyncpa [#allocation11 + $0x1], 1 }
 0x27c   :  { %856 = vsyncpa [#allocation14], 1 }
 0x27d   :  { %858 = vsyncpa [#allocation14 + $0x1], 1 }
 0x27e   :  { %859 = vsyncpa [#allocation9], 1 }
 0x27f   :  { %861 = vsyncpa [#allocation9 + $0x1], 1 }

</bundles_post_ra>
